<compile_context>
chip_gen: v7x
topology: tpu7x:2x2x1
jax: 0.10.0
libtpu: 0.0.40
codegen_flags: <defaults>
</compile_context>

<pallas_src>
import functools

import jax
import jax.numpy as jnp
from jax.experimental import pallas as pl
from jax.experimental.pallas import tpu as pltpu

H1, H2, H3, NCLS = 256, 128, 64, 2
H3PAD = 128        # hidden3 padded to a full 128-lane vreg width
NROWS = 8          # classifier head rows padded to one f32 sublane tile
DROP_P = 0.5


def _round_up(x, m):
    return (x + m - 1) // m * m


def _random_bits(seed_scalar, row_offset, shape):
    """Per-element uint32 pseudo-random bits from a global element counter.

    Multiply-free, iota/shift/xor/add only (lowers under Mosaic and interpret).
    Trimmed vs. the full Thomas Wang mix: we only consume 2 bits per element,
    so ~10 VPU ops of mixing is plenty for a p=0.5 Bernoulli mask.
    The counter is the *global* element index, so masks are tiling-invariant.
    """
    r = jax.lax.broadcasted_iota(jnp.int32, shape, 0) + row_offset   # global row
    c = jax.lax.broadcasted_iota(jnp.int32, shape, 1)                # column
    x = (((r << 8) | c) + seed_scalar).astype(jnp.uint32)            # H1 == 256 == 1<<8
    x = x + (x << 4)          # carry-mix low bits upward
    x = x ^ (x >> 11)
    x = x + (x << 7)
    x = x ^ (x >> 13)
    x = x ^ (x >> 16)         # fold heavily-mixed high half into bits 0/1
    return x


def _make_kernel(tile_n, apply_dropout):
    def mlp_kernel(seed_ref,
                   x_ref, w1_ref, b1_ref, w2_ref, b2_ref,
                   w3_ref, b3_ref, w4t_ref, b4t_ref,
                   out_ref):
        row_off = pl.program_id(0) * tile_n

        # One random draw per tile at the h1 shape; both masks derive from it.
        if apply_dropout:
            bits = _random_bits(seed_ref[0], row_off, (tile_n, H1))

        x = x_ref[...].astype(jnp.bfloat16)

        # hidden1: Linear(d, 256) + ReLU (+ dropout; 1/(1-p) folded into w2)
        h1 = jnp.dot(x, w1_ref[...], preferred_element_type=jnp.float32) + b1_ref[...]
        h1 = jnp.maximum(h1, 0.0)
        if apply_dropout:
            keep1 = (bits & jnp.uint32(1)) == jnp.uint32(0)
            h1 = jnp.where(keep1, h1, 0.0)

        # hidden2: Linear(256, 128) + ReLU (+ dropout; 1/(1-p) folded into w3)
        h2 = jnp.dot(h1.astype(jnp.bfloat16), w2_ref[...],
                     preferred_element_type=jnp.float32) + b2_ref[...]
        h2 = jnp.maximum(h2, 0.0)
        if apply_dropout:
            keep2 = ((bits[:, :H2] >> 1) & jnp.uint32(1)) == jnp.uint32(0)
            h2 = jnp.where(keep2, h2, 0.0)

        # hidden3: Linear(128, 64->128 padded) + ReLU (pad cols stay exactly 0)
        h3 = jnp.dot(h2.astype(jnp.bfloat16), w3_ref[...],
                     preferred_element_type=jnp.float32) + b3_ref[...]
        h3 = jnp.maximum(h3, 0.0)

        # classifica: Linear(64, 2), computed *transposed* so the output store is
        # lane-dense along the batch dim: logits_t[c, n] = sum_k w4t[c,k]*h3[n,k].
        # Pad rows (2..7) of b4t are -1e30, so they are already "masked".
        logits_t = jax.lax.dot_general(
            w4t_ref[...], h3.astype(jnp.bfloat16),
            dimension_numbers=(((1,), (1,)), ((), ())),
            preferred_element_type=jnp.float32) + b4t_ref[...]

        # log_softmax over the class axis (sublanes); pad rows underflow to exp()=0.
        m = jnp.max(logits_t, axis=0, keepdims=True)
        s = logits_t - m
        lse = jnp.log(jnp.sum(jnp.exp(s), axis=0, keepdims=True))
        out_ref[...] = s - lse

    return mlp_kernel


@functools.partial(jax.jit, static_argnames=("tile_n", "training"))
def mlp_forward(x, params, seed, tile_n=None, training=True):
    """x: [N, D] float32 (or bfloat16). params: dict of f32 (w, b), w stored [in, out]."""
    n, d = x.shape
    if tile_n is None:
        n8 = _round_up(n, 8)
        if n8 < 512:
            tile_n = n8                                   # single tile
        else:
            # >=2 grid steps (v7x megacore), multiple of 128 (lane-dense
            # transposed output), cap 2048 (amortize ~0.35us/step overhead,
            # still well inside the scoped VMEM limit).
            tile_n = min(2048, _round_up((n8 + 1) // 2, 128))
    n_pad = _round_up(n, tile_n)
    xp = jnp.pad(x, ((0, n_pad - n), (0, 0))) if n_pad != n else x

    inv_keep = 1.0 / (1.0 - DROP_P)
    drop_scale = inv_keep if training else 1.0

    # bf16 weights feeding f32-accumulating MXU dots.
    # Dropout scale folded into w2 / w3; hidden3 padded 64 -> 128; head stored
    # transposed (8, 128) with zero pad weights and -1e30 pad biases.
    w1 = params["w1"].astype(jnp.bfloat16)
    w2 = (params["w2"] * drop_scale).astype(jnp.bfloat16)
    w3 = (jnp.pad(params["w3"], ((0, 0), (0, H3PAD - H3))) * drop_scale).astype(jnp.bfloat16)
    w4t = jnp.pad(params["w4"].T, ((0, NROWS - NCLS), (0, H3PAD - H3))).astype(jnp.bfloat16)
    b1, b2 = params["b1"], params["b2"]
    b3 = jnp.pad(params["b3"], ((0, 0), (0, H3PAD - H3)))
    b4t = jnp.concatenate(
        [params["b4"].reshape(NCLS, 1).astype(jnp.float32),
         jnp.full((NROWS - NCLS, 1), -1e30, jnp.float32)], axis=0)

    grid = (n_pad // tile_n,)
    x_spec = pl.BlockSpec((tile_n, d), lambda i, seed_ref: (i, 0))
    whole = lambda shape: pl.BlockSpec(shape, lambda i, seed_ref: (0, 0))
    out_spec = pl.BlockSpec((NROWS, tile_n), lambda i, seed_ref: (0, i))

    flops = 2 * n_pad * (d * H1 + H1 * H2 + H2 * H3PAD + H3PAD * NROWS)
    bytes_accessed = (
        xp.size * xp.dtype.itemsize + NROWS * n_pad * 4
        + (w1.size + w2.size + w3.size + w4t.size) * 2
        + (b1.size + b2.size + b3.size + b4t.size) * 4)
    cost = pl.CostEstimate(flops=int(flops),
                           transcendentals=int(n_pad * NROWS),
                           bytes_accessed=int(bytes_accessed))

    out_t = pl.pallas_call(
        _make_kernel(tile_n, training),
        out_shape=jax.ShapeDtypeStruct((NROWS, n_pad), jnp.float32),
        grid_spec=pltpu.PrefetchScalarGridSpec(
            num_scalar_prefetch=1,
            grid=grid,
            in_specs=[
                x_spec,                                   # x: streamed per tile
                whole(w1.shape), whole(b1.shape),         # weights/biases: VMEM-resident
                whole(w2.shape), whole(b2.shape),
                whole(w3.shape), whole(b3.shape),
                whole(w4t.shape), whole(b4t.shape),
            ],
            out_specs=out_spec,
        ),
        compiler_params=pltpu.CompilerParams(
            dimension_semantics=("parallel",),            # megacore on v7x
            vmem_limit_bytes=32 * 1024 * 1024),           # safe on v5e/v6e/v7x
        cost_estimate=cost,
    )(seed, xp, w1, b1, w2, b2, w3, b3, w4t, b4t)

    # (NROWS, n_pad) -> (n, NCLS); only the first 2 rows are real classes.
    return out_t[:NCLS, :n].T


def init_params(key, model_dimension):
    """Deterministic init mimicking nn.Linear default (U[-1/sqrt(in), 1/sqrt(in)]).
    Weights stored as [in, out] (PyTorch stores [out, in]; we pre-transpose)."""
    dims = [(model_dimension, H1), (H1, H2), (H2, H3), (H3, NCLS)]
    params = {}
    for idx, (fin, fout) in enumerate(dims, start=1):
        key, kw, kb = jax.random.split(key, 3)
        bound = 1.0 / (fin ** 0.5)
        params[f"w{idx}"] = jax.random.uniform(
            kw, (fin, fout), jnp.float32, minval=-bound, maxval=bound)
        params[f"b{idx}"] = jax.random.uniform(
            kb, (1, fout), jnp.float32, minval=-bound, maxval=bound)
    return params


def _ref_forward_eval(x, params):
    """Pure-JAX eval-mode reference (no dropout), mirroring the kernel's casts."""
    bf = jnp.bfloat16
    h1 = jnp.maximum(jnp.dot(x.astype(bf), params["w1"].astype(bf),
                             preferred_element_type=jnp.float32) + params["b1"], 0.0)
    h2 = jnp.maximum(jnp.dot(h1.astype(bf), params["w2"].astype(bf),
                             preferred_element_type=jnp.float32) + params["b2"], 0.0)
    h3 = jnp.maximum(jnp.dot(h2.astype(bf), params["w3"].astype(bf),
                             preferred_element_type=jnp.float32) + params["b3"], 0.0)
    logits = jnp.dot(h3.astype(bf), params["w4"].astype(bf),
                     preferred_element_type=jnp.float32) + params["b4"]
    return jax.nn.log_softmax(logits, axis=-1)


if __name__ == "__main__":
    model_dimension = 32
    batch = 8

    key = jax.random.PRNGKey(0)
    key, kx = jax.random.split(key)
    x = jax.random.normal(kx, (batch, model_dimension), jnp.float32)
    params = init_params(key, model_dimension)
    seed = jnp.array([1234], dtype=jnp.int32)

    # Training mode (F.dropout default): distribution-level dropout applied.
    out = mlp_forward(x, params, seed, training=True)
    out = jax.block_until_ready(out)
    assert out.shape == (batch, NCLS), out.shape
    assert bool(jnp.all(jnp.isfinite(out)))
    assert jnp.allclose(jnp.sum(jnp.exp(out), axis=-1), 1.0, atol=1e-4)

    # Eval mode: deterministic, compare against a pure-JAX reference.
    out_eval = jax.block_until_ready(mlp_forward(x, params, seed, training=False))
    ref = _ref_forward_eval(x, params)
    assert out_eval.shape == (batch, NCLS)
    assert jnp.allclose(out_eval, ref, atol=2e-2, rtol=2e-2)
    assert jnp.allclose(jnp.sum(jnp.exp(out_eval), axis=-1), 1.0, atol=1e-4)

    print("KERNEL_OK")
</pallas_src>

<mosaic_0001>
module attributes {stable_mosaic.version = 11 : i64} {
  func.func @mlp_kernel(%arg0: i32, %arg1: memref<1xi32, #tpu.memory_space<smem>>, %arg2: memref<8x32xf32, #tpu.memory_space<vmem>>, %arg3: memref<32x256xbf16, #tpu.memory_space<vmem>>, %arg4: memref<1x256xf32, #tpu.memory_space<vmem>>, %arg5: memref<256x128xbf16, #tpu.memory_space<vmem>>, %arg6: memref<1x128xf32, #tpu.memory_space<vmem>>, %arg7: memref<128x128xbf16, #tpu.memory_space<vmem>>, %arg8: memref<1x128xf32, #tpu.memory_space<vmem>>, %arg9: memref<8x128xbf16, #tpu.memory_space<vmem>>, %arg10: memref<8x1xf32, #tpu.memory_space<vmem>>, %arg11: memref<8x8xf32, #tpu.memory_space<vmem>>) attributes {dimension_semantics = [#tpu.dimension_semantics<parallel>], iteration_bounds = array<i64: 1>, scalar_prefetch = 1 : i64, scratch_operands = 0 : i64, tpu.core_type = #tpu.core_type<tc>, window_params = [{transform_indices = @transform_0, window_bounds = array<i64: 8, 32>}, {pipeline_mode = #tpu.pipeline_mode<synchronous>, transform_indices = @transform_1, window_bounds = array<i64: 32, 256>}, {pipeline_mode = #tpu.pipeline_mode<synchronous>, transform_indices = @transform_2, window_bounds = array<i64: 1, 256>}, {pipeline_mode = #tpu.pipeline_mode<synchronous>, transform_indices = @transform_3, window_bounds = array<i64: 256, 128>}, {pipeline_mode = #tpu.pipeline_mode<synchronous>, transform_indices = @transform_4, window_bounds = array<i64: 1, 128>}, {pipeline_mode = #tpu.pipeline_mode<synchronous>, transform_indices = @transform_5, window_bounds = array<i64: 128, 128>}, {pipeline_mode = #tpu.pipeline_mode<synchronous>, transform_indices = @transform_6, window_bounds = array<i64: 1, 128>}, {pipeline_mode = #tpu.pipeline_mode<synchronous>, transform_indices = @transform_7, window_bounds = array<i64: 8, 128>}, {pipeline_mode = #tpu.pipeline_mode<synchronous>, transform_indices = @transform_8, window_bounds = array<i64: 8, 1>}, {transform_indices = @transform_9, window_bounds = array<i64: 8, 8>}]} {
    %c8_i32 = arith.constant 8 : i32
    %0 = arith.muli %arg0, %c8_i32 : i32
    %c0 = arith.constant 0 : index
    %1 = memref.load %arg1[%c0] : memref<1xi32, #tpu.memory_space<smem>>
    %2 = tpu.iota {dimensions = array<i32: 0>} : vector<8x256xi32>
    %3 = vector.broadcast %0 : i32 to vector<8x256xi32>
    %4 = arith.addi %2, %3 : vector<8x256xi32>
    %5 = tpu.iota {dimensions = array<i32: 1>} : vector<8x256xi32>
    %c8_i32_0 = arith.constant 8 : i32
    %6 = vector.broadcast %c8_i32_0 : i32 to vector<8x256xi32>
    %7 = arith.shli %4, %6 : vector<8x256xi32>
    %8 = arith.ori %7, %5 : vector<8x256xi32>
    %9 = vector.broadcast %1 : i32 to vector<8x256xi32>
    %10 = arith.addi %8, %9 : vector<8x256xi32>
    %c4_i32 = arith.constant 4 : i32
    %11 = vector.broadcast %c4_i32 : i32 to vector<8x256xi32>
    %12 = arith.shli %10, %11 : vector<8x256xi32>
    %13 = arith.addi %10, %12 : vector<8x256xi32>
    %c11_i32 = arith.constant 11 : i32
    %14 = vector.broadcast %c11_i32 : i32 to vector<8x256xi32>
    %15 = arith.shrui %13, %14 : vector<8x256xi32>
    %16 = arith.xori %13, %15 : vector<8x256xi32>
    %c7_i32 = arith.constant 7 : i32
    %17 = vector.broadcast %c7_i32 : i32 to vector<8x256xi32>
    %18 = arith.shli %16, %17 : vector<8x256xi32>
    %19 = arith.addi %16, %18 : vector<8x256xi32>
    %c13_i32 = arith.constant 13 : i32
    %20 = vector.broadcast %c13_i32 : i32 to vector<8x256xi32>
    %21 = arith.shrui %19, %20 : vector<8x256xi32>
    %22 = arith.xori %19, %21 : vector<8x256xi32>
    %c16_i32 = arith.constant 16 : i32
    %23 = vector.broadcast %c16_i32 : i32 to vector<8x256xi32>
    %24 = arith.shrui %22, %23 : vector<8x256xi32>
    %25 = arith.xori %22, %24 : vector<8x256xi32>
    %c0_1 = arith.constant 0 : index
    %c0_2 = arith.constant 0 : index
    %26 = vector.load %arg2[%c0_1, %c0_2] : memref<8x32xf32, #tpu.memory_space<vmem>>, vector<8x32xf32>
    %27 = arith.truncf %26 : vector<8x32xf32> to vector<8x32xbf16>
    %c0_3 = arith.constant 0 : index
    %c0_4 = arith.constant 0 : index
    %28 = vector.load %arg3[%c0_3, %c0_4] : memref<32x256xbf16, #tpu.memory_space<vmem>>, vector<32x256xbf16>
    %cst = arith.constant dense<0.000000e+00> : vector<8x256xf32>
    %29 = tpu.matmul %27, %28, %cst {dimension_numbers = #tpu.dot_dimension_numbers<[1], [0], [0], [1], [0, 0, 1, 1], [], []>} : vector<8x32xbf16>, vector<32x256xbf16>, vector<8x256xf32> -> vector<8x256xf32>
    %c0_5 = arith.constant 0 : index
    %c0_6 = arith.constant 0 : index
    %30 = vector.load %arg4[%c0_5, %c0_6] : memref<1x256xf32, #tpu.memory_space<vmem>>, vector<1x256xf32>
    %31 = vector.broadcast %30 : vector<1x256xf32> to vector<8x256xf32>
    %32 = arith.addf %29, %31 : vector<8x256xf32>
    %cst_7 = arith.constant 0.000000e+00 : f32
    %33 = vector.broadcast %cst_7 : f32 to vector<8x256xf32>
    %34 = arith.maximumf %32, %33 : vector<8x256xf32>
    %c1_i32 = arith.constant 1 : i32
    %35 = vector.broadcast %c1_i32 : i32 to vector<8x256xi32>
    %36 = arith.andi %25, %35 : vector<8x256xi32>
    %c0_i32 = arith.constant 0 : i32
    %37 = vector.broadcast %c0_i32 : i32 to vector<8x256xi32>
    %38 = arith.cmpi eq, %36, %37 : vector<8x256xi32>
    %cst_8 = arith.constant 0.000000e+00 : f32
    %39 = vector.broadcast %cst_8 : f32 to vector<8x256xf32>
    %40 = arith.select %38, %34, %39 : vector<8x256xi1>, vector<8x256xf32>
    %41 = arith.truncf %40 : vector<8x256xf32> to vector<8x256xbf16>
    %c0_9 = arith.constant 0 : index
    %c0_10 = arith.constant 0 : index
    %42 = vector.load %arg5[%c0_9, %c0_10] : memref<256x128xbf16, #tpu.memory_space<vmem>>, vector<256x128xbf16>
    %cst_11 = arith.constant dense<0.000000e+00> : vector<8x128xf32>
    %43 = tpu.matmul %41, %42, %cst_11 {dimension_numbers = #tpu.dot_dimension_numbers<[1], [0], [0], [1], [0, 0, 1, 1], [], []>} : vector<8x256xbf16>, vector<256x128xbf16>, vector<8x128xf32> -> vector<8x128xf32>
    %c0_12 = arith.constant 0 : index
    %c0_13 = arith.constant 0 : index
    %44 = vector.load %arg6[%c0_12, %c0_13] : memref<1x128xf32, #tpu.memory_space<vmem>>, vector<1x128xf32>
    %45 = vector.broadcast %44 : vector<1x128xf32> to vector<8x128xf32>
    %46 = arith.addf %43, %45 : vector<8x128xf32>
    %cst_14 = arith.constant 0.000000e+00 : f32
    %47 = vector.broadcast %cst_14 : f32 to vector<8x128xf32>
    %48 = arith.maximumf %46, %47 : vector<8x128xf32>
    %49 = vector.extract_strided_slice %25 {offsets = [0, 0], sizes = [8, 128], strides = [1, 1]} : vector<8x256xi32> to vector<8x128xi32>
    %c1_i32_15 = arith.constant 1 : i32
    %50 = vector.broadcast %c1_i32_15 : i32 to vector<8x128xi32>
    %51 = arith.shrui %49, %50 : vector<8x128xi32>
    %c1_i32_16 = arith.constant 1 : i32
    %52 = vector.broadcast %c1_i32_16 : i32 to vector<8x128xi32>
    %53 = arith.andi %51, %52 : vector<8x128xi32>
    %c0_i32_17 = arith.constant 0 : i32
    %54 = vector.broadcast %c0_i32_17 : i32 to vector<8x128xi32>
    %55 = arith.cmpi eq, %53, %54 : vector<8x128xi32>
    %cst_18 = arith.constant 0.000000e+00 : f32
    %56 = vector.broadcast %cst_18 : f32 to vector<8x128xf32>
    %57 = arith.select %55, %48, %56 : vector<8x128xi1>, vector<8x128xf32>
    %58 = arith.truncf %57 : vector<8x128xf32> to vector<8x128xbf16>
    %c0_19 = arith.constant 0 : index
    %c0_20 = arith.constant 0 : index
    %59 = vector.load %arg7[%c0_19, %c0_20] : memref<128x128xbf16, #tpu.memory_space<vmem>>, vector<128x128xbf16>
    %cst_21 = arith.constant dense<0.000000e+00> : vector<8x128xf32>
    %60 = tpu.matmul %58, %59, %cst_21 {dimension_numbers = #tpu.dot_dimension_numbers<[1], [0], [0], [1], [0, 0, 1, 1], [], []>} : vector<8x128xbf16>, vector<128x128xbf16>, vector<8x128xf32> -> vector<8x128xf32>
    %c0_22 = arith.constant 0 : index
    %c0_23 = arith.constant 0 : index
    %61 = vector.load %arg8[%c0_22, %c0_23] : memref<1x128xf32, #tpu.memory_space<vmem>>, vector<1x128xf32>
    %62 = vector.broadcast %61 : vector<1x128xf32> to vector<8x128xf32>
    %63 = arith.addf %60, %62 : vector<8x128xf32>
    %cst_24 = arith.constant 0.000000e+00 : f32
    %64 = vector.broadcast %cst_24 : f32 to vector<8x128xf32>
    %65 = arith.maximumf %63, %64 : vector<8x128xf32>
    %c0_25 = arith.constant 0 : index
    %c0_26 = arith.constant 0 : index
    %66 = vector.load %arg9[%c0_25, %c0_26] : memref<8x128xbf16, #tpu.memory_space<vmem>>, vector<8x128xbf16>
    %67 = arith.truncf %65 : vector<8x128xf32> to vector<8x128xbf16>
    %cst_27 = arith.constant dense<0.000000e+00> : vector<8x8xf32>
    %68 = tpu.matmul %66, %67, %cst_27 {dimension_numbers = #tpu.dot_dimension_numbers<[1], [1], [0], [0], [0, 0, 1, 0], [], []>} : vector<8x128xbf16>, vector<8x128xbf16>, vector<8x8xf32> -> vector<8x8xf32>
    %c0_28 = arith.constant 0 : index
    %c0_29 = arith.constant 0 : index
    %69 = vector.load %arg10[%c0_28, %c0_29] : memref<8x1xf32, #tpu.memory_space<vmem>>, vector<8x1xf32>
    %70 = vector.broadcast %69 : vector<8x1xf32> to vector<8x8xf32>
    %71 = arith.addf %68, %70 : vector<8x8xf32>
    %cst_30 = arith.constant dense<0xFF800000> : vector<8xf32>
    %72 = vector.multi_reduction <maximumf>, %71, %cst_30 [0] : vector<8x8xf32> to vector<8xf32>
    %73 = vector.shape_cast %72 : vector<8xf32> to vector<1x8xf32>
    %74 = vector.broadcast %73 : vector<1x8xf32> to vector<8x8xf32>
    %75 = arith.subf %71, %74 : vector<8x8xf32>
    %76 = math.exp %75 : vector<8x8xf32>
    %cst_31 = arith.constant dense<0.000000e+00> : vector<8xf32>
    %77 = vector.multi_reduction <add>, %76, %cst_31 [0] : vector<8x8xf32> to vector<8xf32>
    %78 = vector.shape_cast %77 : vector<8xf32> to vector<1x8xf32>
    %79 = math.log %78 : vector<1x8xf32>
    %80 = vector.broadcast %79 : vector<1x8xf32> to vector<8x8xf32>
    %81 = arith.subf %75, %80 : vector<8x8xf32>
    %c0_32 = arith.constant 0 : index
    %c0_33 = arith.constant 0 : index
    %82 = vector.load %arg11[%c0_32, %c0_33] : memref<8x8xf32, #tpu.memory_space<vmem>>, vector<8x8xf32>
    tpu.vector_store %arg11[%c0_32, %c0_33], %81 {strides = array<i32>} : memref<8x8xf32, #tpu.memory_space<vmem>>, vector<8x8xf32>,
    return
  }
  func.func @transform_0(%arg0: i32, %arg1: memref<1xi32, #tpu.memory_space<smem>>) -> (i32, i32) {
    %c0_i32 = arith.constant 0 : i32
    %c0_i32_0 = arith.constant 0 : i32
    return %arg0, %c0_i32 : i32, i32
  }
  func.func @transform_1(%arg0: i32, %arg1: memref<1xi32, #tpu.memory_space<smem>>) -> (i32, i32) {
    %c0_i32 = arith.constant 0 : i32
    %c0_i32_0 = arith.constant 0 : i32
    %c0_i32_1 = arith.constant 0 : i32
    return %c0_i32, %c0_i32_0 : i32, i32
  }
  func.func @transform_2(%arg0: i32, %arg1: memref<1xi32, #tpu.memory_space<smem>>) -> (i32, i32) {
    %c0_i32 = arith.constant 0 : i32
    %c0_i32_0 = arith.constant 0 : i32
    %c0_i32_1 = arith.constant 0 : i32
    return %c0_i32, %c0_i32_0 : i32, i32
  }
  func.func @transform_3(%arg0: i32, %arg1: memref<1xi32, #tpu.memory_space<smem>>) -> (i32, i32) {
    %c0_i32 = arith.constant 0 : i32
    %c0_i32_0 = arith.constant 0 : i32
    %c0_i32_1 = arith.constant 0 : i32
    return %c0_i32, %c0_i32_0 : i32, i32
  }
  func.func @transform_4(%arg0: i32, %arg1: memref<1xi32, #tpu.memory_space<smem>>) -> (i32, i32) {
    %c0_i32 = arith.constant 0 : i32
    %c0_i32_0 = arith.constant 0 : i32
    %c0_i32_1 = arith.constant 0 : i32
    return %c0_i32, %c0_i32_0 : i32, i32
  }
  func.func @transform_5(%arg0: i32, %arg1: memref<1xi32, #tpu.memory_space<smem>>) -> (i32, i32) {
    %c0_i32 = arith.constant 0 : i32
    %c0_i32_0 = arith.constant 0 : i32
    %c0_i32_1 = arith.constant 0 : i32
    return %c0_i32, %c0_i32_0 : i32, i32
  }
  func.func @transform_6(%arg0: i32, %arg1: memref<1xi32, #tpu.memory_space<smem>>) -> (i32, i32) {
    %c0_i32 = arith.constant 0 : i32
    %c0_i32_0 = arith.constant 0 : i32
    %c0_i32_1 = arith.constant 0 : i32
    return %c0_i32, %c0_i32_0 : i32, i32
  }
  func.func @transform_7(%arg0: i32, %arg1: memref<1xi32, #tpu.memory_space<smem>>) -> (i32, i32) {
    %c0_i32 = arith.constant 0 : i32
    %c0_i32_0 = arith.constant 0 : i32
    %c0_i32_1 = arith.constant 0 : i32
    return %c0_i32, %c0_i32_0 : i32, i32
  }
  func.func @transform_8(%arg0: i32, %arg1: memref<1xi32, #tpu.memory_space<smem>>) -> (i32, i32) {
    %c0_i32 = arith.constant 0 : i32
    %c0_i32_0 = arith.constant 0 : i32
    %c0_i32_1 = arith.constant 0 : i32
    return %c0_i32, %c0_i32_0 : i32, i32
  }
  func.func @transform_9(%arg0: i32, %arg1: memref<1xi32, #tpu.memory_space<smem>>) -> (i32, i32) {
    %c0_i32 = arith.constant 0 : i32
    %c0_i32_0 = arith.constant 0 : i32
    return %c0_i32, %arg0 : i32, i32
  }
}

</mosaic_0001>

<bundles_post_ra>
// kernel: mlp_forward.1
= control target key start
LH: loop header
LB: loop body
LE: loop exit
PB: predicated region body
PF: predicated region fallthrough
CT: control target
= control target key end

     0   :  { %v667_v1 = vmov 0   ;;  %vm108_vm0 = vcmask 261120   ;;  %v668_v23 = vmov 0.0   ;;  %v37_v30 = vlaneseq  ;;  %s847_s2 = inlined_call_operand.vmem [shape: bf16[32,256], index: 2, kind: input, shape index: {}]   ;;  %s848_s1 = inlined_call_operand.vmem [shape: f32[8,32], index: 1, kind: input, shape index: {}]   ;;  %s849_s4 = inlined_call_operand.vmem [shape: bf16[256,128], index: 4, kind: input, shape index: {}]   ;;  %s850_s6 = inlined_call_operand.vmem [shape: bf16[128,128], index: 6, kind: input, shape index: {}]   ;;  %s851_s0 = inlined_call_operand.<no memory space> [shape: s32[1], index: 0, kind: input, shape index: {}]   ;;  %s852_s3 = inlined_call_operand.vmem [shape: f32[1,256], index: 3, kind: input, shape index: {}]   ;;  %s853_s5 = inlined_call_operand.vmem [shape: f32[1,128], index: 5, kind: input, shape index: {}]   ;;  %s854_s9 = inlined_call_operand.vmem [shape: f32[8,1], index: 9, kind: input, shape index: {}]   ;;  %s855_s7 = inlined_call_operand.vmem [shape: f32[1,128], index: 7, kind: input, shape index: {}]   ;;  %s856_s8 = inlined_call_operand.vmem [shape: bf16[8,128], index: 8, kind: input, shape index: {}]   ;;  %s857_s10 = inlined_call_operand.vmem [shape: f32[8,8], index: 10, kind: output, shape index: {}]  }
   0x1   :  { %v633_v0 = vld [vmem:[%s847_s2 + $0x4] ss:$8 sps:$4 sm:$0xff]   ;;  %144 = vmatprep.mubr.bf16.mxu0 %v667_v1  ;;  %632 = vset.pattern.permute.xlu0 %v667_v1  ;;  %v635_v2 = vld [vmem:[%s847_s2] ss:$8 sps:$4 sm:$0xff]   ;;  %v636_v3 = vld [vmem:[%s847_s2 + $0x14] ss:$8 sps:$4 sm:$0xff]   ;;  %v47_v37 = vstv %s851_s0 }
   0x2   :  { %112 = vmatprep.subr.bf16.mxu0 %v633_v0  ;;  %v638_v4 = vld [vmem:[%s847_s2 + $0x10] ss:$8 sps:$4 sm:$0xff]   ;;  %v70_v5 = vld [vmem:[%s848_s1] sm:$0xff]  ;;  %v641_v8 = vld [vmem:[%s849_s4 + $0x48] sm:$0xff]   ;;  %v38_v31 = vshrl.u32 %v37_v30, 7  ;;  %v42_v32 = vand.u32 127, %v37_v30 }
   0x3   :  { %113 = vmatpush1.bf16.msra.mxu0 %v635_v2  ;;  %v639_v6 = vld [vmem:[%s849_s4 + $0x40] sm:$0xff]   ;;  %v71_v9 = vpack.c.bf16 %v70_v5, %v70_v5  ;;  %v642_v10 = vld [vmem:[%s849_s4 + $0x8] sm:$0xff]   ;;  %v643_v11 = vld [vmem:[%s849_s4 + $0x50] sm:$0xff]   ;;  %vm669_vm5 = vmmov 0   ;;  %vm504_vm8 = vcmask 64512  }
   0x4   :  { %114 = vmatprep.subr.bf16.mxu0 %v636_v3  ;;  %v640_v7 = vld [vmem:[%s849_s4] sm:$0xff]   ;;  %570 = vmatprep.subr.bf16.mxu1 %v639_v6  ;;  %v644_v12 = vld [vmem:[%s849_s4 + $0x10] sm:$0xff]   ;;  %v645_v13 = vld [vmem:[%s849_s4 + $0x58] sm:$0xff]   ;;  %v43_v33 = vadd.s32 128, %v42_v32  ;;  %v44_v34 = vshll.u32 %v38_v31, 8  ;;  %v80_v58 = vsub.s32 0, %v38_v31 }
   0x5   :  { %571 = vmatpush3.bf16.msra.mxu1 %v640_v7  ;;  %v646_v14 = vld [vmem:[%s849_s4 + $0x18] sm:$0xff]   ;;  %v647_v15 = vld [vmem:[%s849_s4 + $0x60] sm:$0xff]   ;;  %v649_v17 = vld [vmem:[%s849_s4 + $0x68] sm:$0xff]   ;;  %v84_v60 = vsub.s32 1, %v38_v31 }
   0x6   :  { %572 = vmatprep.subr.bf16.mxu1 %v641_v8  ;;  %v648_v16 = vld [vmem:[%s849_s4 + $0x20] sm:$0xff]   ;;  %v650_v18 = vld [vmem:[%s849_s4 + $0x28] sm:$0xff]   ;;  %v651_v19 = vld [vmem:[%s849_s4 + $0x70] sm:$0xff]   ;;  %v46_v35 = vor.u32 %v44_v34, %v43_v33  ;;  %v45_v36 = vor.u32 %v44_v34, %v42_v32 }
   0x7   :  { %115 = vmatpush1.bf16.msra.mxu0 %v638_v4  ;;  %v652_v20 = vld [vmem:[%s849_s4 + $0x30] sm:$0xff]   ;;  %v653_v21 = vld [vmem:[%s849_s4 + $0x78] sm:$0xff]   ;;  %v655_v24 = vld [vmem:[%s850_s6] sm:$0xff]  }
   0x8   :  { %v654_v22 = vld [vmem:[%s849_s4 + $0x38] sm:$0xff]   ;;  %603 = vmatprep.subr.bf16.mxu0 %v668_v23  ;;  %v656_v25 = vld [vmem:[%s850_s6 + $0x8] sm:$0xff]   ;;  %v657_v26 = vld [vmem:[%s850_s6 + $0x10] sm:$0xff]   ;;  %v49_v38 = vadd.s32 %v47_v37, %v46_v35  ;;  %v48_v39 = vadd.s32 %v47_v37, %v45_v36 }
   0x9   :  { %573 = vmatpush3.bf16.msra.mxu1 %v642_v10  ;;  %v658_v27 = vld [vmem:[%s850_s6 + $0x18] sm:$0xff]   ;;  %v659_v28 = vld [vmem:[%s850_s6 + $0x20] sm:$0xff]   ;;  %v660_v29 = vld [vmem:[%s850_s6 + $0x28] sm:$0xff]  }
   0xa   :  { %534 = vmatmul.mubr.msk.bf16.vlgmr.msra.gmra.mrb[0].mxu0 %vm108_vm0, %v71_v9  ;;  %574 = vmatprep.subr.bf16.mxu1 %v643_v11  ;;  %v51_v40 = vshll.u32 %v49_v38, 4  ;;  %v50_v41 = vshll.u32 %v48_v39, 4  ;;  %v76_v59 = vld [vmem:[%s852_s3] sm:$0x3] }
   0xb   :  { %604 = vmatpush3.bf16.msra.mxu0 %v655_v24  ;;  %v81_v63 = vrot.slane %v76_v59, %v80_v58  ;;  %v85_v0 = vrot.slane %v76_v59, %v84_v60  ;;  %619 = vmatprep.mubr.msk.bf16.mxu0 %vm669_vm5, %v668_v23  ;;  %v456_v35 = vld [vmem:[%s856_s8] sm:$0xf] }
   0xc   :  { %605 = vmatprep.subr.bf16.mxu0 %v668_v23  ;;  %v53_v42 = vadd.s32 %v51_v40, %v49_v38  ;;  %v52_v43 = vadd.s32 %v50_v41, %v48_v39 }
   0xd   :  { %575 = vmatpush3.bf16.msra.mxu1 %v644_v12 }
   0xe   :  { %576 = vmatprep.subr.bf16.mxu1 %v645_v13  ;;  %v55_v44 = vshrl.u32 %v53_v42, 11  ;;  %v54_v45 = vshrl.u32 %v52_v43, 11  ;;  %v661_v13 = vld [vmem:[%s850_s6 + $0x30] sm:$0xff]  }
   0xf   :  { %606 = vmatpush3.bf16.msra.mxu0 %v656_v25 }
  0x10   :  { %607 = vmatprep.subr.bf16.mxu0 %v668_v23  ;;  %v57_v46 = vxor.u32 %v55_v44, %v53_v42  ;;  %v56_v47 = vxor.u32 %v54_v45, %v52_v43 }
  0x11   :  { %577 = vmatpush3.bf16.msra.mxu1 %v646_v14  ;;  %v662_v14 = vld [vmem:[%s850_s6 + $0x38] sm:$0xff]  }
  0x12   :  { %578 = vmatprep.subr.bf16.mxu1 %v647_v15  ;;  %v59_v48 = vshll.u32 %v57_v46, 7  ;;  %v58_v49 = vshll.u32 %v56_v47, 7 }
  0x13   :  { %608 = vmatpush3.bf16.msra.mxu0 %v657_v26 }
  0x14   :  { %609 = vmatprep.subr.bf16.mxu0 %v668_v23  ;;  %v61_v50 = vadd.s32 %v59_v48, %v57_v46  ;;  %v60_v51 = vadd.s32 %v58_v49, %v56_v47 }
  0x15   :  { %579 = vmatpush3.bf16.msra.mxu1 %v648_v16 }
  0x16   :  { %580 = vmatprep.subr.bf16.mxu1 %v649_v17  ;;  %v63_v52 = vshrl.u32 %v61_v50, 13  ;;  %v62_v53 = vshrl.u32 %v60_v51, 13 }
  0x17   :  { %610 = vmatpush3.bf16.msra.mxu0 %v658_v27  ;;  %v558_v27 = vld [vmem:[%s855_s7] ss:$0 sm:$0xff] }
  0x18   :  { %611 = vmatprep.subr.bf16.mxu0 %v668_v23  ;;  %v65_v54 = vxor.u32 %v63_v52, %v61_v50  ;;  %v64_v55 = vxor.u32 %v62_v53, %v60_v51 }
  0x19   :  { %581 = vmatpush3.bf16.msra.mxu1 %v650_v18  ;;  %v535_v18 = vld [vmem:[%s853_s5] ss:$0 sm:$0xff] }
  0x1a   :  { %582 = vmatprep.subr.bf16.mxu1 %v651_v19  ;;  %v67_v56 = vshrl.u32 %v65_v54, 16  ;;  %v66_v57 = vshrl.u32 %v64_v55, 16 }
  0x1b   :  { %612 = vmatpush3.bf16.msra.mxu0 %v659_v28 }
  0x1c   :  { %613 = vmatprep.subr.bf16.mxu0 %v668_v23  ;;  %v69_v61 = vxor.u32 %v67_v56, %v65_v54  ;;  %v68_v62 = vxor.u32 %v66_v57, %v64_v55 }
  0x1d   :  { %583 = vmatpush3.bf16.msra.mxu1 %v652_v20 }
  0x1e   :  { %584 = vmatprep.subr.bf16.mxu1 %v653_v21  ;;  %v156_v1 = vand.u32 1, %v69_v61  ;;  %v155_v2 = vand.u32 1, %v68_v62  ;;  %v339_v15 = vshrl.u32 %v68_v62, 1 }
  0x1f   :  { %614 = vmatpush3.bf16.msra.mxu0 %v660_v29 }
  0x20   :  { %615 = vmatprep.subr.bf16.mxu0 %v668_v23  ;;  %vm158_vm1 = vcmp.eq.s32.totalorder %v156_v1, 0  ;;  %vm157_vm2 = vcmp.eq.s32.totalorder %v155_v2, 0  ;;  %v340_v17 = vand.u32 1, %v339_v15 }
  0x21   :  { %585 = vmatpush3.bf16.msra.mxu1 %v654_v22  ;;  %vm552_vm3 = vmpackc.low %vm158_vm1, %vm158_vm1 }
  0x22   :  { %623 = vmatprep.subr.bf16.mxu1 %v668_v23  ;;  %vm555_vm4 = vmpackc.low %vm157_vm2, %vm157_vm2  ;;  %vm341_vm6 = vcmp.eq.s32.totalorder %v340_v17, 0 }
  0x23   :  { %616 = vmatpush3.bf16.msra.mxu0 %v661_v13  ;;  %vm567_vm7 = vmpackc.low %vm341_vm6, %vm341_vm6 }
  0x24   :  { %617 = vmatprep.subr.bf16.mxu0 %v668_v23 }
  0x27   :  { %618 = vmatpush3.bf16.msra.mxu0 %v662_v14 }
  0xdd   :  { %v146_v3 = vpop.f32.mrb[0].mxu0 }
  0xde   :  { %v147_v4 = vadd.f32 %v146_v3, %v81_v63  ;;  %v148_v5 = vpop.f32.mrb[1].mxu0 }
  0xdf   :  { %v149_v6 = vadd.f32 %v148_v5, %v85_v0  ;;  %v150_v7 = vpop.f32.mrb[2].mxu0 }
  0xe0   :  { %v153_v8 = vmax.f32 %v147_v4, 0.0  ;;  %v151_v9 = vpop.f32.mrb[3].mxu0 }
  0xe1   :  { %v154_v10 = vmax.f32 %v149_v6, 0.0 }
  0xe2   :  { %v556_v12 = vpack.c.bf16 %v153_v8, %v153_v8 }
  0xe3   :  { %v553_v11 = vpack.c.bf16 %v154_v10, %v154_v10 }
  0xe5   :  { %554 = vmatprep.mubr.msk.bf16.mxu1 %vm552_vm3, %v553_v11 }
  0xe6   :  { %557 = vmatmul.mubr.msk.bf16.vlgmr.msra.gmra.mrb[0].mxu1 %vm555_vm4, %v556_v12 }
  0xe7   :  { %625 = vmatprep.mubr.msk.bf16.mxu1 %vm669_vm5, %v668_v23  ;;  %v458_v23 = vld [vmem:[%s854_s9] sm:$0xff] }
  0xe8   :  { %461 = vperm.xlu0 %632, %v458_v23  }
 0x167   :  { %v462_v36 = vpop.permute.xlu0 %461 }
 0x1b9   :  { %v586_v16 = vpop.f32.mrb[0].mxu1 }
 0x1ba   :  { %v587_v19 = vpop.f32.mrb[1].mxu1 }
 0x1bb   :  { %v588_v20 = vadd.f32 %v587_v19, %v586_v16  ;;  %v589_v21 = vpop.f32.mrb[2].mxu1 }
 0x1bc   :  { %v590_v22 = vpop.f32.mrb[3].mxu1 }
 0x1bd   :  { %v333_v24 = vadd.f32 %v588_v20, %v535_v18 }
 0x1bf   :  { %v338_v25 = vmax.f32 %v333_v24, 0.0 }
 0x1c1   :  { %v568_v26 = vpack.c.bf16 %v338_v25, %v338_v25 }
 0x1c3   :  { %620 = vmatmul.mubr.msk.bf16.vlgmr.msra.gmra.mrb[4].mxu0 %vm567_vm7, %v568_v26 }
 0x296   :  { %v449_v28 = vpop.f32.mrb[4].mxu0 }
 0x297   :  { %v450_v29 = vadd.f32 %v558_v27, %v449_v28  ;;  %v621_v30 = vpop.f32.mrb[5].mxu0 }
 0x298   :  { %v452_v31 = vpop.f32.mrb[6].mxu0 }
 0x299   :  { %v455_v32 = vmax.f32 %v450_v29, 0.0  ;;  %v622_v33 = vpop.f32.mrb[7].mxu0 }
 0x29b   :  { %v457_v34 = vpack.c.bf16 %v455_v32, %v455_v32 }
 0x29d   :  { %624 = vmatpush3.bf16.xpose.msra.mxu1 %v457_v34 }
 0x2a4   :  { %626 = vmatmul.mubr.bf16.vlgmr.msra.gmra.mrb[4].mxu1 %v456_v35 }
 0x377   :  { %v498_v37 = vpop.f32.mrb[4].mxu1 }
 0x378   :  { %v499_v38 = vadd.f32 %v498_v37, %v462_v36  ;;  %v627_v39 = vpop.f32.mrb[5].mxu1 }
 0x379   :  { %v501_v40 = vpop.f32.mrb[6].mxu1 }
 0x37a   :  { %v505_v41 = vsel %vm504_vm8, %v499_v38, -inf  ;;  %v628_v42 = vpop.f32.mrb[7].mxu1 }
 0x37b   :  { %v506_v43 = vrot.slane %v505_v41, 4 }
 0x37d   :  { %v507_v44 = vmax.f32 %v505_v41, %v506_v43 }
 0x37f   :  { %v508_v45 = vrot.slane %v507_v44, 2 }
 0x381   :  { %v509_v46 = vmax.f32 %v507_v44, %v508_v45 }
 0x383   :  { %v510_v47 = vrot.slane %v509_v46, 1 }
 0x385   :  { %v511_v48 = vmax.f32 %v509_v46, %v510_v47 }
 0x387   :  { %v512_v49 = vsub.f32 %v499_v38, %v511_v48 }
 0x389   :  { %v513_v50 = vmul.f32 1.442695, %v512_v49 }
 0x38b   :  { %663 = vpow2.f32 %v513_v50 }
 0x395   :  { %v664_v51 = vpop.eup %663 }
 0x396   :  { %v515_v52 = vsel %vm504_vm8, %v664_v51, 0.0 }
 0x397   :  { %v516_v53 = vrot.slane %v515_v52, 4 }
 0x399   :  { %v517_v54 = vadd.f32 %v516_v53, %v515_v52 }
 0x39b   :  { %v518_v55 = vrot.slane %v517_v54, 2 }
 0x39d   :  { %v519_v56 = vadd.f32 %v518_v55, %v517_v54 }
 0x39f   :  { %v520_v57 = vrot.slane %v519_v56, 1 }
 0x3a1   :  { %v521_v58 = vadd.f32 %v520_v57, %v519_v56 }
 0x3a3   :  { %665 = vlog2.f32 %v521_v58 }
 0x3ad   :  { %v666_v59 = vpop.eup %665 }
 0x3ae   :  { %v523_v60 = vmul.f32 0.6931472, %v666_v59 }
 0x3b0   :  { %v524_v61 = vsub.f32 %v512_v49, %v523_v60 }
 0x3b2   :  { %525 = vst.msk [vmem:[%s857_s10] sm:$0xff] %vm504_vm8, %v524_v61 }

</bundles_post_ra>
